<compile_context>
chip_gen: v7x
topology: tpu7x:2x2x1
jax: 0.10.0
libtpu: 0.0.40
codegen_flags: <defaults>
</compile_context>

<pallas_src>
import functools

import jax
import jax.numpy as jnp
from jax.experimental import pallas as pl
from jax.experimental.pallas import tpu as pltpu

KERNEL_SIZE = 3
TEMPERATURE = 0.07
SMOOTH = 0.1
PAD = (KERNEL_SIZE - 1) // 2
INV_TEMPERATURE = 1.0 / TEMPERATURE


def _spatial_softmax_kernel(xmax_ref, x_ref, o_ref, *, H, W):
    # xmax_ref: (1,) global max in SMEM
    # x_ref / o_ref: (TN, H*W) block -- TN flattened image planes, lane-dense.
    TN, HW = x_ref.shape
    m = xmax_ref[0]

    e = jnp.exp((x_ref[...].astype(jnp.float32) - m) * INV_TEMPERATURE)

    lane = jax.lax.broadcasted_iota(jnp.int32, (TN, HW), 1)
    col = lane % W
    zeros = jnp.zeros_like(e)

    # Separable zero-padded box sum; all shifts go through the XLU (pltpu.roll),
    # masking/adds on the VPU.  No cross-plane mixing (rolls are along axis 1
    # only and masked at row / image boundaries).
    # Horizontal k-tap within each image row.
    rsum = e
    for d in range(1, PAD + 1):
        left = jnp.where(col >= d, pltpu.roll(e, d, axis=1), zeros)            # e[y, x-d]
        right = jnp.where(col < W - d, pltpu.roll(e, HW - d, axis=1), zeros)   # e[y, x+d]
        rsum = rsum + left + right
    # Vertical k-tap across image rows (shift by multiples of W).
    box = rsum
    for d in range(1, PAD + 1):
        up = jnp.where(lane >= d * W, pltpu.roll(rsum, d * W, axis=1), zeros)             # rsum[y-d, x]
        down = jnp.where(lane < (H - d) * W, pltpu.roll(rsum, HW - d * W, axis=1), zeros)  # rsum[y+d, x]
        box = box + up + down

    o_ref[...] = (e * pl.reciprocal(box + SMOOTH, approx=False)).astype(o_ref.dtype)


def _planes_per_block(n_planes, plane_elems, itemsize, target_bytes=1 << 20):
    # Largest block (multiple of 8 planes, or the full plane count) whose input
    # tile is ~target_bytes: amortizes per-step overhead while staying far below
    # the 32 MiB scoped VMEM limit even double-buffered on v7x (64 MiB physical).
    tn = max(1, target_bytes // max(1, plane_elems * itemsize))
    if tn >= n_planes:
        return n_planes
    return min(n_planes, max(8, (tn // 8) * 8))


def spatial_softmax(x):
    N, C, H, W = x.shape
    if C != 1:
        raise ValueError("conv weights are [1,1,k,k] -> input channels must be 1")
    P = N * C
    HW = H * W

    # Lane-dense layout: one flattened plane per row (metadata-only reshape).
    x2 = x.reshape(P, HW)

    # Global max (scalar) via XLA reduction -- scales to any size and pipelines.
    xmax = jnp.max(x2).astype(jnp.float32).reshape((1,))

    TN = _planes_per_block(P, HW, x.dtype.itemsize)
    grid = pl.cdiv(P, TN)

    total = P * HW
    cost = pl.CostEstimate(
        flops=16 * total,
        transcendentals=2 * total,                       # exp + reciprocal
        bytes_accessed=2 * total * x.dtype.itemsize,     # one read + one write pass
    )

    out = pl.pallas_call(
        functools.partial(_spatial_softmax_kernel, H=H, W=W),
        out_shape=jax.ShapeDtypeStruct((P, HW), x.dtype),
        grid_spec=pltpu.PrefetchScalarGridSpec(
            num_scalar_prefetch=0,
            grid=(grid,),
            in_specs=[
                pl.BlockSpec(memory_space=pltpu.SMEM),       # global max scalar
                pl.BlockSpec((TN, HW), lambda i: (i, 0)),
            ],
            out_specs=pl.BlockSpec((TN, HW), lambda i: (i, 0)),
        ),
        compiler_params=pltpu.CompilerParams(
            dimension_semantics=("parallel",),
            vmem_limit_bytes=32 * 1024 * 1024,
        ),
        cost_estimate=cost,
    )(xmax, x2)

    return out.reshape(N, C, H, W)


def reference(x):
    # Pure-JAX reference mirroring the PyTorch forward.
    m = jnp.max(x)
    e = jnp.exp((x - m) / TEMPERATURE)
    w = jnp.ones((1, 1, KERNEL_SIZE, KERNEL_SIZE), e.dtype)
    under = jax.lax.conv_general_dilated(
        e, w, window_strides=(1, 1), padding=[(PAD, PAD), (PAD, PAD)],
        dimension_numbers=("NCHW", "OIHW", "NCHW"))
    return e / (under + SMOOTH)


if __name__ == "__main__":
    key = jax.random.PRNGKey(0)
    x = jax.random.normal(key, (8, 1, 16, 16), dtype=jnp.float32)

    out = spatial_softmax(x)
    jax.block_until_ready(out)

    ref = reference(x)
    assert out.shape == x.shape and out.dtype == x.dtype
    if not jnp.allclose(out, ref, rtol=1e-3, atol=1e-6):
        err = jnp.max(jnp.abs(out - ref))
        raise AssertionError(f"Pallas kernel output mismatch vs reference (max abs err {err})")
    print("KERNEL_OK")
</pallas_src>

<mosaic_0001>
module attributes {stable_mosaic.version = 11 : i64} {
  func.func @_spatial_softmax_kernel(%arg0: i32, %arg1: memref<1xf32, #tpu.memory_space<smem>>, %arg2: memref<8x256xf32, #tpu.memory_space<vmem>>, %arg3: memref<8x256xf32, #tpu.memory_space<vmem>>) attributes {dimension_semantics = [#tpu.dimension_semantics<parallel>], iteration_bounds = array<i64: 1>, scalar_prefetch = 0 : i64, scratch_operands = 0 : i64, tpu.core_type = #tpu.core_type<tc>, window_params = [{transform_indices = @transform_0, window_bounds = array<i64: 1>}, {transform_indices = @transform_1, window_bounds = array<i64: 8, 256>}, {transform_indices = @transform_2, window_bounds = array<i64: 8, 256>}]} {
    %c0 = arith.constant 0 : index
    %0 = memref.load %arg1[%c0] : memref<1xf32, #tpu.memory_space<smem>>
    %c0_0 = arith.constant 0 : index
    %c0_1 = arith.constant 0 : index
    %1 = vector.load %arg2[%c0_0, %c0_1] : memref<8x256xf32, #tpu.memory_space<vmem>>, vector<8x256xf32>
    %2 = vector.broadcast %0 : f32 to vector<8x256xf32>
    %3 = arith.subf %1, %2 : vector<8x256xf32>
    %cst = arith.constant 14.2857141 : f32
    %4 = vector.broadcast %cst : f32 to vector<8x256xf32>
    %5 = arith.mulf %3, %4 : vector<8x256xf32>
    %6 = math.exp %5 : vector<8x256xf32>
    %7 = tpu.iota {dimensions = array<i32: 1>} : vector<8x256xi32>
    %c16_i32 = arith.constant 16 : i32
    %c0_i32 = arith.constant 0 : i32
    %8 = arith.cmpi eq, %c16_i32, %c0_i32 : i32
    %c1_i32 = arith.constant 1 : i32
    %9 = arith.select %8, %c1_i32, %c16_i32 : i32
    %10 = vector.broadcast %9 : i32 to vector<8x256xi32>
    %11 = arith.remsi %7, %10 : vector<8x256xi32>
    %c0_i32_2 = arith.constant 0 : i32
    %12 = vector.broadcast %c0_i32_2 : i32 to vector<8x256xi32>
    %13 = arith.cmpi ne, %11, %12 : vector<8x256xi32>
    %c0_i32_3 = arith.constant 0 : i32
    %14 = vector.broadcast %c0_i32_3 : i32 to vector<8x256xi32>
    %15 = arith.cmpi slt, %11, %14 : vector<8x256xi32>
    %c0_i32_4 = arith.constant 0 : i32
    %16 = arith.cmpi slt, %9, %c0_i32_4 : i32
    %17 = vector.broadcast %16 : i1 to vector<8x256xi1>
    %18 = vector.broadcast %17 : vector<8x256xi1> to vector<8x256xi1>
    %19 = arith.xori %15, %18 : vector<8x256xi1>
    %20 = arith.andi %19, %13 : vector<8x256xi1>
    %21 = vector.broadcast %9 : i32 to vector<8x256xi32>
    %22 = arith.addi %11, %21 : vector<8x256xi32>
    %23 = arith.select %20, %22, %11 : vector<8x256xi1>, vector<8x256xi32>
    %cst_5 = arith.constant 0.000000e+00 : f32
    %24 = vector.broadcast %cst_5 : f32 to vector<8x256xf32>
    %c1_i32_6 = arith.constant 1 : i32
    %25 = vector.broadcast %c1_i32_6 : i32 to vector<8x256xi32>
    %26 = arith.cmpi sge, %23, %25 : vector<8x256xi32>
    %c1_i32_7 = arith.constant 1 : i32
    %27 = tpu.dynamic_rotate %6 by %c1_i32_7 dim 1 : vector<8x256xf32>, i32 -> vector<8x256xf32>
    %28 = arith.select %26, %27, %24 : vector<8x256xi1>, vector<8x256xf32>
    %c15_i32 = arith.constant 15 : i32
    %29 = vector.broadcast %c15_i32 : i32 to vector<8x256xi32>
    %30 = arith.cmpi slt, %23, %29 : vector<8x256xi32>
    %c255_i32 = arith.constant 255 : i32
    %31 = tpu.dynamic_rotate %6 by %c255_i32 dim 1 : vector<8x256xf32>, i32 -> vector<8x256xf32>
    %32 = arith.select %30, %31, %24 : vector<8x256xi1>, vector<8x256xf32>
    %33 = arith.addf %6, %28 : vector<8x256xf32>
    %34 = arith.addf %33, %32 : vector<8x256xf32>
    %c16_i32_8 = arith.constant 16 : i32
    %35 = vector.broadcast %c16_i32_8 : i32 to vector<8x256xi32>
    %36 = arith.cmpi sge, %7, %35 : vector<8x256xi32>
    %c16_i32_9 = arith.constant 16 : i32
    %37 = tpu.dynamic_rotate %34 by %c16_i32_9 dim 1 : vector<8x256xf32>, i32 -> vector<8x256xf32>
    %38 = arith.select %36, %37, %24 : vector<8x256xi1>, vector<8x256xf32>
    %c240_i32 = arith.constant 240 : i32
    %39 = vector.broadcast %c240_i32 : i32 to vector<8x256xi32>
    %40 = arith.cmpi slt, %7, %39 : vector<8x256xi32>
    %c240_i32_10 = arith.constant 240 : i32
    %41 = tpu.dynamic_rotate %34 by %c240_i32_10 dim 1 : vector<8x256xf32>, i32 -> vector<8x256xf32>
    %42 = arith.select %40, %41, %24 : vector<8x256xi1>, vector<8x256xf32>
    %43 = arith.addf %34, %38 : vector<8x256xf32>
    %44 = arith.addf %43, %42 : vector<8x256xf32>
    %cst_11 = arith.constant 1.000000e-01 : f32
    %45 = vector.broadcast %cst_11 : f32 to vector<8x256xf32>
    %46 = arith.addf %44, %45 : vector<8x256xf32>
    %47 = tpu.reciprocal %46 : vector<8x256xf32> -> vector<8x256xf32>
    %48 = arith.mulf %6, %47 : vector<8x256xf32>
    %c0_12 = arith.constant 0 : index
    %c0_13 = arith.constant 0 : index
    %49 = vector.load %arg3[%c0_12, %c0_13] : memref<8x256xf32, #tpu.memory_space<vmem>>, vector<8x256xf32>
    tpu.vector_store %arg3[%c0_12, %c0_13], %48 {strides = array<i32>} : memref<8x256xf32, #tpu.memory_space<vmem>>, vector<8x256xf32>,
    return
  }
  func.func @transform_0(%arg0: i32) -> i32 {
    %c0_i32 = arith.constant 0 : i32
    %c0_i32_0 = arith.constant 0 : i32
    return %c0_i32 : i32
  }
  func.func @transform_1(%arg0: i32) -> (i32, i32) {
    %c0_i32 = arith.constant 0 : i32
    %c0_i32_0 = arith.constant 0 : i32
    return %arg0, %c0_i32 : i32, i32
  }
  func.func @transform_2(%arg0: i32) -> (i32, i32) {
    %c0_i32 = arith.constant 0 : i32
    %c0_i32_0 = arith.constant 0 : i32
    return %arg0, %c0_i32 : i32, i32
  }
}

</mosaic_0001>

<bundles_post_ra>
// kernel: tpu_custom_call.1
= control target key start
LH: loop header
LB: loop body
LE: loop exit
PB: predicated region body
PF: predicated region fallthrough
CT: control target
= control target key end

     0   :  { %8 = vsyncpa [#allocation4], 0  ;;  %s261_s0 = inlined_call_operand.<no memory space> [shape: f32[1], index: 0, kind: input, shape index: {}]   ;;  %s262_s1 = inlined_call_operand.hbm [shape: f32[8,256], index: 1, kind: input, shape index: {}]   ;;  %s263_s2 = inlined_call_operand.hbm [shape: f32[8,256], index: 2, kind: output, shape index: {}]  }
   0x1   :  { %9 = vsyncpa [#allocation5], 0  ;;  %s201_s9 = smov [#allocation3]   ;;  %s153_s13 = scalar_lea.hbm %s262_s1, 256 }
   0x2   :  { %s18_s10 = sshll.u32 %s201_s9, 4  ;;  %p154_p0 = scmp.ne.s32.totalorder %s262_s1, %s153_s13  ;;  %s19_s10 = int_to_ptr.vmem [resolvable:$true] %s18_s10 }
   0x3   :  { %p157_p1 = scmp.lt.u32.totalorder %s153_s13, %s262_s1 }
   0x5   :  { %p159_p2 = pnand %p157_p1, %p154_p0 }
   0x7   :  { %162 = shalt.err (!%p159_p2)
}
   0x8   :  { %s163_s18 = scalar_lea.vmem %s19_s10, 256  ;;  %p168_p4 = scmp.lt.s32.totalorder %s19_s10, %s19_s10 }
   0x9   :  { %p164_p3 = scmp.ne.s32.totalorder %s19_s10, %s163_s18  ;;  %p169_p5 = scmp.lt.s32.totalorder %s163_s18, %s163_s18 }
   0xb   :  { %p170_p6 = por %p169_p5, %p168_p4 }
   0xd   :  { %p171_p7 = pnand %p170_p6, %p164_p3 }
   0xf   :  { %174 = shalt.err (!%p171_p7)
}
  0x10   :  { %21 = dma.hbm_to_vmem [thread:$0]  %s262_s1, 256, %s19_s10, [#allocation4]  }
  0x11   :  { %197 = dma.done.wait [#allocation4], 256  }
  0x12   :  { %198 = vsyncadd [#allocation4], 4294967040  ;;  %v28_v0 = vstv %s261_s0  ;;  %v26_v1 = vld [vmem:[#allocation3] sm:$0xff]  ;;  %v27_v2 = vld [vmem:[#allocation3 + $0x8] sm:$0xff]  ;;  %s202_s23 = smov 127   ;;  %s203_s1 = smov 1   ;;  %v37_v11 = vlaneseq }
  0x13   :  { %v29_v3 = vsub.f32 %v26_v1, %v28_v0  ;;  %v30_v4 = vsub.f32 %v27_v2, %v28_v0  ;;  %s204_s0 = smov 16   ;;  %s205_s24 = smov 112  }
  0x14   :  { %v38_v12 = vand.u32 127, %v37_v11  ;;  %s206_s25 = smov [#allocation6]  }
  0x15   :  { %v31_v5 = vmul.f32 14.285714, %v29_v3  ;;  %v32_v6 = vmul.f32 14.285714, %v30_v4  ;;  %s130_s26 = sshll.u32 %s206_s25, 4  ;;  %s131_s26 = int_to_ptr.vmem [resolvable:$true] %s130_s26 }
  0x16   :  { %v39_v13 = vadd.s32 128, %v38_v12  ;;  %v44_v14 = vand.u32 15, %v38_v12  ;;  %vm81_vm0 = vcmp.lt.s32.totalorder %v38_v12, 127  ;;  %vm70_vm1 = vcmp.lt.s32.totalorder %v38_v12, 1  ;;  %s175_s27 = scalar_lea.vmem %s131_s26, 256  ;;  %p180_p9 = scmp.lt.s32.totalorder %s131_s26, %s131_s26 }
  0x17   :  { %v33_v7 = vmul.f32 1.442695, %v31_v5  ;;  %v35_v8 = vmul.f32 1.442695, %v32_v6  ;;  %vm96_vm6 = vcmp.lt.s32.totalorder %v38_v12, 16  ;;  %vm90_vm7 = vcmp.ge.s32.totalorder %v38_v12, 16  ;;  %p176_p8 = scmp.ne.s32.totalorder %s131_s26, %s175_s27  ;;  %p181_p10 = scmp.lt.s32.totalorder %s175_s27, %s175_s27 }
  0x18   :  { %v51_v15 = vand.u32 15, %v39_v13  ;;  %vm64_vm2 = vcmp.ge.s32.totalorder %v44_v14, 1  ;;  %vm75_vm4 = vcmp.lt.s32.totalorder %v44_v14, 15  ;;  %vm107_vm8 = vcmp.lt.s32.totalorder %v38_v12, 112 }
  0x19   :  { %145 = vpow2.f32 %v33_v7  ;;  %vm102_vm9 = vcmp.lt.s32.totalorder %v39_v13, 240  ;;  %p182_p11 = por %p181_p10, %p180_p9 }
  0x1a   :  { %147 = vpow2.f32 %v35_v8  ;;  %vm65_vm3 = vcmp.ge.s32.totalorder %v51_v15, 1  ;;  %vm76_vm5 = vcmp.lt.s32.totalorder %v51_v15, 15 }
  0x1b   :  { %p183_p12 = pnand %p182_p11, %p176_p8 }
  0x23   :  { %v237_v9 = vpop.eup %145 }
  0x24   :  { %77 = vrot.lane.b32.xlu1 %v237_v9, %s202_s23  ;;  %66 = vrot.lane.b32.xlu0 %v237_v9, %s203_s1  ;;  %v241_v10 = vpop.eup %147 }
  0x28   :  { %79 = vrot.lane.b32.xlu1 %v241_v10, %s202_s23  ;;  %68 = vrot.lane.b32.xlu0 %v241_v10, %s203_s1 }
  0x96   :  { %v78_v16 = vpop.permute.xlu1 %77  ;;  %v67_v17 = vpop.permute.xlu0 %66 }
  0x9a   :  { %v80_v18 = vpop.permute.xlu1 %79  ;;  %v69_v19 = vpop.permute.xlu0 %68 }
  0x9b   :  { %v82_v20 = vsel %vm81_vm0, %v78_v16, %v80_v18  ;;  %v83_v21 = vsel %vm81_vm0, %v80_v18, %v78_v16  ;;  %v71_v22 = vsel %vm70_vm1, %v67_v17, %v69_v19  ;;  %v72_v23 = vsel %vm70_vm1, %v69_v19, %v67_v17 }
  0x9c   :  { %v73_v24 = vsel %vm64_vm2, %v72_v23, 0.0  ;;  %v74_v25 = vsel %vm65_vm3, %v71_v22, 0.0  ;;  %v84_v28 = vsel %vm75_vm4, %v82_v20, 0.0  ;;  %v85_v29 = vsel %vm76_vm5, %v83_v21, 0.0 }
  0x9d   :  { %v86_v26 = vadd.f32 %v237_v9, %v73_v24  ;;  %v87_v27 = vadd.f32 %v241_v10, %v74_v25 }
  0x9f   :  { %v88_v30 = vadd.f32 %v86_v26, %v84_v28  ;;  %v89_v31 = vadd.f32 %v87_v27, %v85_v29 }
  0xa1   :  { %92 = vrot.lane.b32.xlu0 %v88_v30, %s204_s0  ;;  %94 = vrot.lane.b32.xlu1 %v89_v31, %s204_s0 }
  0xa5   :  { %103 = vrot.lane.b32.xlu0 %v88_v30, %s205_s24  ;;  %105 = vrot.lane.b32.xlu1 %v89_v31, %s205_s24 }
 0x113   :  { %v93_v32 = vpop.permute.xlu0 %92  ;;  %v95_v33 = vpop.permute.xlu1 %94 }
 0x114   :  { %v98_v34 = vsel %vm96_vm6, %v95_v33, %v93_v32  ;;  %v97_v35 = vsel %vm96_vm6, %v93_v32, %v95_v33 }
 0x115   :  { %v99_v36 = vsel %vm90_vm7, %v98_v34, 0.0  ;;  %v113_v40 = vadd.f32 %v97_v35, %v89_v31 }
 0x116   :  { %v112_v37 = vadd.f32 %v99_v36, %v88_v30 }
 0x117   :  { %v104_v38 = vpop.permute.xlu0 %103  ;;  %v106_v39 = vpop.permute.xlu1 %105 }
 0x118   :  { %v108_v41 = vsel %vm107_vm8, %v104_v38, %v106_v39  ;;  %v109_v42 = vsel %vm107_vm8, %v106_v39, %v104_v38 }
 0x119   :  { %v111_v43 = vsel %vm102_vm9, %v109_v42, 0.0  ;;  %v114_v44 = vadd.f32 %v112_v37, %v108_v41 }
 0x11a   :  { %v115_v45 = vadd.f32 %v113_v40, %v111_v43 }
 0x11b   :  { %v116_v46 = vadd.f32 0.1, %v114_v44 }
 0x11c   :  { %v117_v47 = vadd.f32 0.1, %v115_v45 }
 0x11d   :  { %149 = vrcp.f32 %v116_v46 }
 0x11e   :  { %151 = vrcp.f32 %v117_v47 }
 0x127   :  { %v150_v48 = vpop.eup %149 }
 0x128   :  { %v152_v49 = vpop.eup %151  ;;  %v120_v50 = vmul.f32 %v150_v48, %v237_v9 }
 0x129   :  { %v121_v51 = vmul.f32 %v152_v49, %v241_v10 }
 0x12a   :  { %122 = vst [vmem:[#allocation6] sm:$0xff] %v120_v50 }
 0x12b   :  { %123 = vst [vmem:[#allocation6 + $0x8] sm:$0xff] %v121_v51 }
 0x12c   :  { %186 = shalt.err (!%p183_p12)
}
 0x12d   :  { %s187_s30 = scalar_lea.hbm %s263_s2, 256 }
 0x12e   :  { %p188_p13 = scmp.ne.s32.totalorder %s263_s2, %s187_s30  ;;  %p191_p0 = scmp.lt.u32.totalorder %s187_s30, %s263_s2 }
 0x130   :  { %p193_p1 = pnand %p191_p0, %p188_p13 }
 0x132   :  { %196 = shalt.err (!%p193_p1)
}
 0x133   :  { %133 = dma.vmem_to_hbm [thread:$0]  %s131_s26, 256, %s263_s2, [#allocation5]  }
 0x134   :  { %199 = dma.done.wait [#allocation5], 256  }
 0x135   :  { %200 = vsyncadd [#allocation5], 4294967040 }
 0x136   :  { %137 = vsyncpa [#allocation4], 1 }
 0x137   :  { %138 = vsyncpa [#allocation5], 1 }

</bundles_post_ra>
